<compile_context>
chip_gen: v7x
topology: tpu7x:2x2x1
jax: 0.10.0
libtpu: 0.0.40
codegen_flags: <defaults>
</compile_context>

<pallas_src>
import functools

import jax
import jax.numpy as jnp
from jax import lax
from jax.experimental import pallas as pl
from jax.experimental.pallas import tpu as pltpu


# ----------------------------------------------------------------------------
# Pallas kernel: row-wise LayerNorm over the last dim, with optional fused
# elementwise `fn` applied (in f32) before the single final cast + store.
# ----------------------------------------------------------------------------
def _layernorm_kernel(x_ref, g_ref, b_ref, o_ref, *, eps, d_valid, fused_fn):
    xf = x_ref[...].astype(jnp.float32)     # (rows_per_block, D_pad) in VMEM
    d_block = xf.shape[-1]
    inv_d = 1.0 / d_valid

    # Two-pass statistics in f32 (matches PyTorch LayerNorm numerics: biased
    # variance, eps inside the rsqrt). Zero-padded lanes contribute 0 to s1;
    # the centered value is masked so they contribute 0 to the variance too.
    s1 = jnp.sum(xf, axis=-1, keepdims=True)
    mean = s1 * inv_d
    centered = xf - mean
    if d_valid != d_block:
        lane = lax.broadcasted_iota(jnp.int32, xf.shape, xf.ndim - 1)
        centered = jnp.where(lane < d_valid, centered, 0.0)
    var = jnp.sum(centered * centered, axis=-1, keepdims=True) * inv_d
    inv_std = lax.rsqrt(var + eps)          # EUP slot

    gamma = g_ref[...]                      # (1, D_pad), already f32
    beta = b_ref[...]                       # (1, D_pad), already f32

    y = centered * inv_std * gamma + beta   # padded lanes -> 0 (gamma/beta pad = 0)

    if fused_fn is not None:
        # Elementwise wrapped `fn`, fused in f32 (tanh/exp land on the EUP
        # slot); single downcast at the store.
        y = fused_fn(y)

    o_ref[...] = y.astype(o_ref.dtype)


# ----------------------------------------------------------------------------
# Tiling helpers.
# ----------------------------------------------------------------------------
def _sublane_multiple(dtype):
    """Native row-packing multiple: 8 for f32, 16 for bf16, 32 for 8-bit."""
    itemsize = jnp.dtype(dtype).itemsize
    return max(8, 32 // max(itemsize, 1))


def _pick_rows_per_block(n_rows, d, dtype, target_bytes=2 << 20):
    """Row tile: ~target_bytes of input, dtype-aware sublane rounding, and
    capped so the grid has >= 2 blocks whenever the row count allows it
    (keeps both v7x TensorCores fed via the "parallel" grid axis)."""
    sub = _sublane_multiple(dtype)
    itemsize = jnp.dtype(dtype).itemsize
    padded_rows = pl.cdiv(n_rows, sub) * sub

    rows = (target_bytes // max(d * itemsize, 1)) // sub * sub
    rows = max(rows, sub)

    if padded_rows >= 2 * sub:
        half = max((padded_rows // 2) // sub * sub, sub)
        rows = min(rows, half)

    return int(min(rows, padded_rows))


def layernorm_pallas(x2d, gamma, beta, *, eps=1e-5, fused_fn=None,
                     rows_per_block=None):
    """LayerNorm over the last dim of a 2-D array [R, D] (+ optional fused
    elementwise fn). D is zero-padded to a multiple of 128 internally so all
    loads/stores are lane-dense."""
    R, D = x2d.shape
    dtype = x2d.dtype

    # Lane-dense padding of the feature dim (biggest single Pallas lever:
    # avoids masked vst.msk partial stores on every row).
    D_pad = pl.cdiv(D, 128) * 128
    if D_pad != D:
        x2d = jnp.pad(x2d, ((0, 0), (0, D_pad - D)))
        gamma = jnp.pad(gamma, (0, D_pad - D))
        beta = jnp.pad(beta, (0, D_pad - D))

    if rows_per_block is None:
        rows_per_block = _pick_rows_per_block(R, D_pad, dtype)

    grid = (pl.cdiv(R, rows_per_block),)    # no divisibility requirement

    # Pre-cast affine params once (no per-tile casts inside the kernel).
    gamma2d = gamma.astype(jnp.float32).reshape(1, D_pad)
    beta2d = beta.astype(jnp.float32).reshape(1, D_pad)

    # Explicit VMEM budget: double-buffered in + out tiles, generous f32
    # intermediate allowance, plus fixed headroom. Capped below v7x physical.
    io_tile = rows_per_block * D_pad * jnp.dtype(dtype).itemsize
    f32_tile = rows_per_block * D_pad * 4
    vmem_limit = 2 * io_tile + 2 * io_tile + 6 * f32_tile + (2 << 20)
    vmem_limit = int(min(vmem_limit, 56 << 20))

    out = pl.pallas_call(
        functools.partial(_layernorm_kernel, eps=eps, d_valid=D,
                          fused_fn=fused_fn),
        out_shape=jax.ShapeDtypeStruct((R, D_pad), dtype),
        grid_spec=pltpu.PrefetchScalarGridSpec(
            num_scalar_prefetch=0,
            grid=grid,
            in_specs=[
                pl.BlockSpec((rows_per_block, D_pad), lambda i: (i, 0)),
                pl.BlockSpec((1, D_pad), lambda i: (0, 0)),
                pl.BlockSpec((1, D_pad), lambda i: (0, 0)),
            ],
            out_specs=pl.BlockSpec((rows_per_block, D_pad), lambda i: (i, 0)),
        ),
        compiler_params=pltpu.CompilerParams(
            dimension_semantics=("parallel",),   # megacore-shardable row axis
            vmem_limit_bytes=vmem_limit,
        ),
    )(x2d, gamma2d, beta2d)

    if D_pad != D:
        out = out[:, :D]
    return out


# ----------------------------------------------------------------------------
# Module-equivalent wrapper:  fn(LayerNorm(x), **kwargs)
# ----------------------------------------------------------------------------
def layer_normalize(x, gamma, beta, fn, *, eps=1e-5, fuse_fn=True, **fn_kwargs):
    """Equivalent of LayerNormalize(dim, fn).forward(x, **kwargs), x: [B, S, D].

    `fuse_fn=True` requires `fn` to be purely elementwise/per-row (e.g. GELU);
    fns that mix rows or contract over D (attention / MLP with weights) must
    use fuse_fn=False and are applied as plain JAX on the normalized output.
    """
    B, S, D = x.shape
    x2d = x.reshape(B * S, D)

    if fuse_fn:
        fused = (lambda y: fn(y, **fn_kwargs))
        y2d = layernorm_pallas(x2d, gamma, beta, eps=eps, fused_fn=fused)
        return y2d.reshape(B, S, D)

    # TODO(synk): non-elementwise wrapped sub-modules (attention / MLP) stay as
    # plain JAX applied to the kernel output; only the LayerNorm is in Pallas.
    y2d = layernorm_pallas(x2d, gamma, beta, eps=eps, fused_fn=None)
    return fn(y2d.reshape(B, S, D), **fn_kwargs)


# ----------------------------------------------------------------------------
# Reference (pure JAX) for correctness checking.
# ----------------------------------------------------------------------------
def layer_normalize_ref(x, gamma, beta, fn, *, eps=1e-5, **fn_kwargs):
    xf = x.astype(jnp.float32)
    mean = jnp.mean(xf, axis=-1, keepdims=True)
    var = jnp.mean((xf - mean) ** 2, axis=-1, keepdims=True)
    y = (xf - mean) * lax.rsqrt(var + eps) * gamma + beta
    return fn(y, **fn_kwargs).astype(x.dtype)


if __name__ == "__main__":
    key = jax.random.PRNGKey(0)
    k_x, k_g, k_b, k_x2 = jax.random.split(key, 4)

    # The wrapped `fn` (stand-in for the sub-module passed to LayerNormalize);
    # elementwise, so it is fused into the Pallas kernel. Note jax.nn.gelu
    # defaults to the tanh approximation (torch.nn.GELU defaults to exact erf);
    # reference and kernel use the same fn, so the test is self-consistent.
    fn = jax.nn.gelu

    # --- main check: lane-dense D (multiple of 128) --------------------------
    B, S, D = 2, 8, 128
    x = jax.random.normal(k_x, (B, S, D), dtype=jnp.float32)
    gamma = jnp.ones((D,), jnp.float32) + 0.1 * jax.random.normal(k_g, (D,), jnp.float32)
    beta = jnp.zeros((D,), jnp.float32) + 0.1 * jax.random.normal(k_b, (D,), jnp.float32)

    out = jax.block_until_ready(layer_normalize(x, gamma, beta, fn))
    ref = layer_normalize_ref(x, gamma, beta, fn)
    assert out.shape == (B, S, D)
    assert jnp.allclose(out, ref, atol=3e-5, rtol=3e-5), "mismatch vs reference"

    # --- padding-path check: D not a multiple of 128 -------------------------
    D2 = 100
    x2 = jax.random.normal(k_x2, (B, S, D2), dtype=jnp.float32)
    g2 = gamma[:D2]
    b2 = beta[:D2]
    out2 = jax.block_until_ready(layer_normalize(x2, g2, b2, fn))
    ref2 = layer_normalize_ref(x2, g2, b2, fn)
    assert out2.shape == (B, S, D2)
    assert jnp.allclose(out2, ref2, atol=3e-5, rtol=3e-5), "mismatch vs reference (padded D)"

    print("KERNEL_OK")
</pallas_src>

<mosaic_0001>
module attributes {stable_mosaic.version = 11 : i64} {
  func.func @_layernorm_kernel(%arg0: i32, %arg1: memref<8x128xf32, #tpu.memory_space<vmem>>, %arg2: memref<1x128xf32, #tpu.memory_space<vmem>>, %arg3: memref<1x128xf32, #tpu.memory_space<vmem>>, %arg4: memref<8x128xf32, #tpu.memory_space<vmem>>) attributes {dimension_semantics = [#tpu.dimension_semantics<parallel>], iteration_bounds = array<i64: 2>, scalar_prefetch = 0 : i64, scratch_operands = 0 : i64, tpu.core_type = #tpu.core_type<tc>, window_params = [{transform_indices = @transform_0, window_bounds = array<i64: 8, 128>}, {pipeline_mode = #tpu.pipeline_mode<synchronous>, transform_indices = @transform_1, window_bounds = array<i64: 1, 128>}, {pipeline_mode = #tpu.pipeline_mode<synchronous>, transform_indices = @transform_2, window_bounds = array<i64: 1, 128>}, {transform_indices = @transform_3, window_bounds = array<i64: 8, 128>}]} {
    %c0 = arith.constant 0 : index
    %c0_0 = arith.constant 0 : index
    %0 = vector.load %arg1[%c0, %c0_0] : memref<8x128xf32, #tpu.memory_space<vmem>>, vector<8x128xf32>
    %cst = arith.constant dense<0.000000e+00> : vector<8xf32>
    %1 = vector.multi_reduction <add>, %0, %cst [1] : vector<8x128xf32> to vector<8xf32>
    %2 = vector.shape_cast %1 : vector<8xf32> to vector<8x1xf32>
    %cst_1 = arith.constant 7.812500e-03 : f32
    %3 = vector.broadcast %cst_1 : f32 to vector<8x1xf32>
    %4 = arith.mulf %2, %3 : vector<8x1xf32>
    %5 = vector.broadcast %4 : vector<8x1xf32> to vector<8x128xf32>
    %6 = arith.subf %0, %5 : vector<8x128xf32>
    %7 = arith.mulf %6, %6 : vector<8x128xf32>
    %cst_2 = arith.constant dense<0.000000e+00> : vector<8xf32>
    %8 = vector.multi_reduction <add>, %7, %cst_2 [1] : vector<8x128xf32> to vector<8xf32>
    %9 = vector.shape_cast %8 : vector<8xf32> to vector<8x1xf32>
    %cst_3 = arith.constant 7.812500e-03 : f32
    %10 = vector.broadcast %cst_3 : f32 to vector<8x1xf32>
    %11 = arith.mulf %9, %10 : vector<8x1xf32>
    %cst_4 = arith.constant 9.99999974E-6 : f32
    %12 = vector.broadcast %cst_4 : f32 to vector<8x1xf32>
    %13 = arith.addf %11, %12 : vector<8x1xf32>
    %14 = math.rsqrt %13 : vector<8x1xf32>
    %c0_5 = arith.constant 0 : index
    %c0_6 = arith.constant 0 : index
    %15 = vector.load %arg2[%c0_5, %c0_6] : memref<1x128xf32, #tpu.memory_space<vmem>>, vector<1x128xf32>
    %c0_7 = arith.constant 0 : index
    %c0_8 = arith.constant 0 : index
    %16 = vector.load %arg3[%c0_7, %c0_8] : memref<1x128xf32, #tpu.memory_space<vmem>>, vector<1x128xf32>
    %17 = vector.broadcast %14 : vector<8x1xf32> to vector<8x128xf32>
    %18 = arith.mulf %6, %17 : vector<8x128xf32>
    %19 = vector.broadcast %15 : vector<1x128xf32> to vector<8x128xf32>
    %20 = arith.mulf %18, %19 : vector<8x128xf32>
    %21 = vector.broadcast %16 : vector<1x128xf32> to vector<8x128xf32>
    %22 = arith.addf %20, %21 : vector<8x128xf32>
    %23 = arith.mulf %22, %22 : vector<8x128xf32>
    %24 = arith.mulf %22, %23 : vector<8x128xf32>
    %cst_9 = arith.constant 4.471500e-02 : f32
    %25 = vector.broadcast %cst_9 : f32 to vector<8x128xf32>
    %26 = arith.mulf %25, %24 : vector<8x128xf32>
    %27 = arith.addf %22, %26 : vector<8x128xf32>
    %cst_10 = arith.constant 0.797884583 : f32
    %28 = vector.broadcast %cst_10 : f32 to vector<8x128xf32>
    %29 = arith.mulf %28, %27 : vector<8x128xf32>
    %30 = math.tanh %29 : vector<8x128xf32>
    %cst_11 = arith.constant 1.000000e+00 : f32
    %31 = vector.broadcast %cst_11 : f32 to vector<8x128xf32>
    %32 = arith.addf %31, %30 : vector<8x128xf32>
    %cst_12 = arith.constant 5.000000e-01 : f32
    %33 = vector.broadcast %cst_12 : f32 to vector<8x128xf32>
    %34 = arith.mulf %33, %32 : vector<8x128xf32>
    %35 = arith.mulf %22, %34 : vector<8x128xf32>
    %c0_13 = arith.constant 0 : index
    %c0_14 = arith.constant 0 : index
    %36 = vector.load %arg4[%c0_13, %c0_14] : memref<8x128xf32, #tpu.memory_space<vmem>>, vector<8x128xf32>
    tpu.vector_store %arg4[%c0_13, %c0_14], %35 {strides = array<i32>} : memref<8x128xf32, #tpu.memory_space<vmem>>, vector<8x128xf32>,
    return
  }
  func.func @transform_0(%arg0: i32) -> (i32, i32) {
    %c0_i32 = arith.constant 0 : i32
    %c0_i32_0 = arith.constant 0 : i32
    return %arg0, %c0_i32 : i32, i32
  }
  func.func @transform_1(%arg0: i32) -> (i32, i32) {
    %c0_i32 = arith.constant 0 : i32
    %c0_i32_0 = arith.constant 0 : i32
    %c0_i32_1 = arith.constant 0 : i32
    return %c0_i32, %c0_i32_0 : i32, i32
  }
  func.func @transform_2(%arg0: i32) -> (i32, i32) {
    %c0_i32 = arith.constant 0 : i32
    %c0_i32_0 = arith.constant 0 : i32
    %c0_i32_1 = arith.constant 0 : i32
    return %c0_i32, %c0_i32_0 : i32, i32
  }
  func.func @transform_3(%arg0: i32) -> (i32, i32) {
    %c0_i32 = arith.constant 0 : i32
    %c0_i32_0 = arith.constant 0 : i32
    return %arg0, %c0_i32 : i32, i32
  }
}

</mosaic_0001>

<bundles_post_ra>
// kernel: tpu_custom_call.1
= control target key start
LH: loop header
LB: loop body
LE: loop exit
PB: predicated region body
PF: predicated region fallthrough
CT: control target
= control target key end

     0   :  { %8 = vsyncpa [#allocation3], 0  ;;  %s663_s0 = inlined_call_operand.hbm [shape: f32[16,128], index: 0, kind: input, shape index: {}]   ;;  %s664_s1 = inlined_call_operand.vmem [shape: f32[1,128], index: 1, kind: input, shape index: {}]   ;;  %s665_s2 = inlined_call_operand.vmem [shape: f32[1,128], index: 2, kind: input, shape index: {}]   ;;  %s666_s3 = inlined_call_operand.hbm [shape: f32[16,128], index: 3, kind: output, shape index: {}]  }
   0x1   :  { %10 = vsyncpa [#allocation3 + $0x1], 0 }
   0x2   :  { %11 = vsyncpa [#allocation4], 0 }
   0x3   :  { %13 = vsyncpa [#allocation4 + $0x1], 0  ;;  %s492_s12 = smov 0   ;;  %s494_s13 = smov 0  }
   0x4   :  { %s496_s14 = smov 0   ;;  %s498_s15 = smov 0  }
   0x5 LB: > { %s513_s16 = sadd.s32 4294967295, %s468_s15   ;;  %s308_s17 = sadd.s32 4294967294, %s468_s15   ;;  %s468_s15 = sphi %s498_s15, %s681_s15   ;;  %s464_s14 = sphi %s496_s14, %s680_s14   ;;  %s460_s13 = sphi %s494_s13, %s679_s13   ;;  %s456_s12 = sphi %s492_s12, %s678_s12  }
   0x6   : > { %s517_s18 = sadd.s32 1, %s468_s15   ;;  %s26_s19 = sadd.s32 1, %s464_s14 }
   0x7   : > { %s23_s20 = ssub.s32 %s468_s15, %s517_s18  ;;  %p33_p0 = scmp.ne.s32.totalorder %s464_s14, %s460_s13 }
   0x8   : > { %p24_p1 = scmp.eq.s32.totalorder %s23_s20, 0  ;;  %p34_p2 = scmp.eq.s32.totalorder %s468_s15, 0 }
   0x9   : > { %p39_p3 = scmp.ne.s32.totalorder %s460_s13, %s456_s12  ;;  %p40_p4 = scmp.eq.s32.totalorder %s513_s16, 0 }
   0xa   : > { %s529_s21 = scalar_select %p24_p1, %s464_s14, %s26_s19  }
   0xb   : > { %p531_p5 = por %p34_p2, %p33_p0  ;;  %p535_p6 = por %p40_p4, %p39_p3 }
   0xc   : > { %p105_p7 = scmp.eq.s32.totalorder %s513_s16, 1  ;;  %p111_p8 = scmp.eq.s32.totalorder %s308_s17, 1 }
   0xd   : > { %p334_p10 = scmp.lt.s32.totalorder %s468_s15, 2  ;;  %s137_s26 = sand.u32 1, %s464_s14  }
   0xe   : > { %p542_p11 = por %p105_p7, %p33_p0  ;;  %p546_p12 = por %p111_p8, %p39_p3 }
   0xf   : > { %s312_s27 = sshll.u32 %s468_s15, 7  ;;  %s311_s28 = sshll.u32 %s137_s26, 3 }
  0x10   : > { %s670_s24 = scalar_select %p542_p11, 1, 0 }
  0x11   : > { %s671_s25 = scalar_select %p546_p12, 1, 0 }
  0x12   : > { %s555_s4 = scalar_lea.hbm %s663_s0, %s312_s27  ;;  %s141_s5 = scalar_lea.vmem [#allocation2], %s311_s28 }
  0x13   : > { %s148_s6 = sshll.u32 %s141_s5, 4  ;;  %p559_p13 = pnand %p334_p10, %p531_p5  ;;  %s563_s6 = int_to_ptr.vmem [resolvable:$true] %s148_s6 }
  0x14   : > { %s138_s8 = scalar_lea.sflag [#allocation3], %s137_s26  ;;  %s372_s9 = scalar_lea.hbm %s555_s4, 128 }
  0x15   : > { %p373_p2 = scmp.ne.s32.totalorder %s555_s4, %s372_s9  ;;  %p374_p3 = pneg %p559_p13 }
  0x16   : > { %s377_s17 = scalar_lea.hbm %s663_s0, 256  ;;  %p378_p5 = scmp.lt.u32.totalorder %s555_s4, %s663_s0 }
  0x17   : > { %p375_p4 = pnand %p374_p3, %p373_p2  ;;  %p379_p8 = scmp.lt.u32.totalorder %s377_s17, %s372_s9 }
  0x18   : > { %p381_p9 = scmp.lt.u32.totalorder %s372_s9, %s555_s4 }
  0x19   : > { %p376_p7 = pneg %p375_p4  ;;  %p380_p10 = por %p379_p8, %p378_p5 }
  0x1b   : > { %p382_p0 = por %p381_p9, %p380_p10 }
  0x1d   : > { %p383_p1 = pnand %p382_p0, %p376_p7 }
  0x1f   : > { %386 = shalt.err (!%p383_p1)
}
  0x20   : > { %s387_s22 = scalar_lea.vmem %s563_s6, 128  ;;  %s470_s26 = smov [#allocation2]  }
  0x21   : > { %p388_p2 = scmp.ne.s32.totalorder %s563_s6, %s387_s22  ;;  %s392_s27 = sshll.u32 %s470_s26, 4  ;;  %s393_s27 = int_to_ptr.vmem [resolvable:$false] %s392_s27 }
  0x22   : > { %s394_s28 = scalar_lea.vmem %s393_s27, 256  ;;  %p395_p11 = scmp.lt.s32.totalorder %s563_s6, %s393_s27 }
  0x23   : > { %p390_p4 = pnand %p388_p2, %p374_p3  ;;  %p396_p5 = scmp.lt.s32.totalorder %s394_s28, %s387_s22 }
  0x25   : > { %p391_p12 = pneg %p390_p4  ;;  %p397_p8 = por %p396_p5, %p395_p11 }
  0x27   : > { %p398_p9 = pnand %p397_p8, %p391_p12 }
  0x29   : > { %401 = shalt.err (!%p398_p9)
}
  0x2a   : > { %329 = dma.hbm_to_vmem [thread:$0]  (!%p559_p13), %s555_s4, 128, %s563_s6, %s138_s8  }
  0x2b   : > { %p673_p0 = scmp.lt.s32.totalorder %s468_s15, 3  ;;  %p674_p1 = scmp.ge.s32.totalorder %s468_s15, 1 }
  0x2d   : > { %p154_p3 = pnand %p674_p1, %p673_p0 }
  0x2e   : > { %s597_s29 = sand.u32 (!%p154_p3), 1, %s460_s13  }
  0x2f   : > { %157 = sbr.rel (%p154_p3) target bundleno = 408 (0x198), region = 32  ;;  %s314_s30 = sshll.u32 (!%p154_p3), %s597_s29, 3 }
  0x30   : > { %s160_s5 = scalar_lea.sflag (!%p154_p3), [#allocation3], %s597_s29  ;;  %s163_s7 = scalar_lea.vmem (!%p154_p3), [#allocation2], %s314_s30 }
  0x36   : > { %447 = dma.done.wait (%p535_p6), %s160_s5, 128  }
  0x37   : > { %449 = vsyncadd (%p535_p6), %s160_s5, 4294967168  ;;  %v186_v0 = vld [vmem:[%s163_s7] sm:$0xff]  ;;  %s319_s9 = sshll.u32 %s513_s16, 7  ;;  %s185_s10 = scalar_lea.vmem [#allocation5], %s314_s30 }
  0x38   : > { %187 = vadd.xlane.f32.xlu0 %v186_v0  ;;  %v316_v9 = vld [vmem:[%s664_s1] ss:$0 sm:$0xff]  ;;  %s238_s11 = sshll.u32 %s185_s10, 4  ;;  %s619_s20 = scalar_lea.hbm %s666_s3, %s319_s9  ;;  %s621_s11 = int_to_ptr.vmem [resolvable:$true] %s238_s11 }
  0x39   : > { %v317_v11 = vld [vmem:[%s665_s2] ss:$0 sm:$0xff]  ;;  %s225_s22 = scalar_lea.sflag [#allocation4], %s597_s29  ;;  %s402_s26 = scalar_lea.vmem %s621_s11, 128 }
  0x3a   : > { %p403_p6 = scmp.ne.s32.totalorder %s621_s11, %s402_s26  ;;  %p675_p11 = scmp.ne.s32.totalorder %s670_s24, 0 }
  0x3b   : > { %s471_s16 = smov [#allocation5]  }
  0x3c   : > { %p404_p12 = pnand %p403_p6, %p675_p11  ;;  %s406_s27 = sshll.u32 %s471_s16, 4  ;;  %s407_s27 = int_to_ptr.vmem [resolvable:$false] %s406_s27 }
  0x3d   : > { %s408_s28 = scalar_lea.vmem %s407_s27, 256  ;;  %p409_p7 = scmp.lt.s32.totalorder %s621_s11, %s407_s27 }
  0x3e   : > { %p405_p13 = pneg %p404_p12  ;;  %p410_p10 = scmp.lt.s32.totalorder %s408_s28, %s402_s26 }
  0x40   : > { %p411_p2 = por %p410_p10, %p409_p7 }
  0x42   : > { %p412_p4 = pnand %p411_p2, %p405_p13 }
  0xc5   : > { %v188_v1 = vpop.xlane.xlu0 %187 }
  0xc6   : > { %v189_v2 = vmul.f32 0.0078125, %v188_v1 }
  0xc8   : > { %v190_v3 = vsub.f32 %v186_v0, %v189_v2 }
  0xca   : > { %v191_v4 = vmul.f32 %v190_v3, %v190_v3 }
  0xcc   : > { %192 = vadd.xlane.f32.xlu0 %v191_v4 }
 0x159   : > { %v193_v5 = vpop.xlane.xlu0 %192 }
 0x15a   : > { %v194_v6 = vmul.f32 0.0078125, %v193_v5 }
 0x15c   : > { %v195_v7 = vadd.f32 1e-05, %v194_v6 }
 0x15e   : > { %368 = vrsqrt.f32 %v195_v7 }
 0x168   : > { %v369_v8 = vpop.eup %368 }
 0x169   : > { %v199_v10 = vmul.f32 %v369_v8, %v190_v3 }
 0x16b   : > { %v206_v12 = vmul.f32 %v316_v9, %v199_v10 }
 0x16d   : > { %v213_v13 = vadd.f32 %v317_v11, %v206_v12 }
 0x16f   : > { %v214_v14 = vmul.f32 %v213_v13, %v213_v13 }
 0x171   : > { %v215_v15 = vmul.f32 %v214_v14, %v213_v13 }
 0x173   : > { %v216_v16 = vmul.f32 0.044715, %v215_v15 }
 0x175   : > { %v217_v17 = vadd.f32 %v216_v16, %v213_v13 }
 0x177   : > { %v218_v18 = vmul.f32 0.7978846, %v217_v17 }
 0x179   : > { %370 = vtanh.f32 %v218_v18 }
 0x183   : > { %v371_v19 = vpop.eup %370 }
 0x184   : > { %v220_v20 = vadd.f32 1.0, %v371_v19 }
 0x186   : > { %v221_v21 = vmul.f32 0.5, %v220_v20 }
 0x188   : > { %v222_v22 = vmul.f32 %v221_v21, %v213_v13 }
 0x18a   : > { %223 = vst [vmem:[%s185_s10] sm:$0xff] %v222_v22 }
 0x18b   : > { %415 = shalt.err (!%p412_p4)
}
 0x18c   : > { %s416_s29 = scalar_lea.hbm %s619_s20, 128  ;;  %s420_s7 = scalar_lea.hbm %s666_s3, 256 }
 0x18d   : > { %p417_p5 = scmp.ne.s32.totalorder %s619_s20, %s416_s29  ;;  %p421_p0 = scmp.lt.u32.totalorder %s619_s20, %s666_s3 }
 0x18e   : > { %p422_p1 = scmp.lt.u32.totalorder %s420_s7, %s416_s29  ;;  %p424_p6 = scmp.lt.u32.totalorder %s416_s29, %s619_s20 }
 0x18f   : > { %p418_p8 = pnand %p417_p5, %p675_p11 }
 0x190   : > { %p423_p3 = por %p422_p1, %p421_p0 }
 0x191   : > { %p419_p9 = pneg %p418_p8 }
 0x192   : > { %p425_p12 = por %p424_p6, %p423_p3 }
 0x194   : > { %p426_p13 = pnand %p425_p12, %p419_p9 }
 0x196   : > { %429 = shalt.err (!%p426_p13)
}
 0x197   : > { %324 = dma.vmem_to_hbm [thread:$0]  (%p675_p11), %s621_s11, 128, %s619_s20, %s225_s22  }
 0x198 PF: > { %s250_s23 = sand.u32 1, %s456_s12   ;;  %p676_p7 = scmp.ne.s32.totalorder %s671_s25, 0 }
 0x199   : > { %p677_p10 = scmp.ge.s32.totalorder %s468_s15, 2  ;;  %s251_s8 = scalar_lea.sflag [#allocation4], %s250_s23 }
 0x19b   : > { %p331_p2 = pnand %p677_p10, %p676_p7 }
 0x19d   : > { %451 = dma.done.wait (!%p331_p2), %s251_s8, 128  }
 0x19e   : > { %453 = vsyncadd (!%p331_p2), %s251_s8, 4294967168  ;;  %p16_p4 = scmp.ge.s32.totalorder %s517_s18, 4   ;;  %s678_s12 = smov %s460_s13 }
 0x19f   : > { %s679_s13 = smov %s464_s14  ;;  %s680_s14 = smov %s529_s21 }
 0x1a0   : > { %s681_s15 = smov %s517_s18  ;;  %18 = sbr.rel (!%p16_p4) target bundleno = 5 (0x5), region = 77 }
 0x1a7   :  { %256 = vsyncpa [#allocation3], 1 }
 0x1a8   :  { %258 = vsyncpa [#allocation3 + $0x1], 1 }
 0x1a9   :  { %259 = vsyncpa [#allocation4], 1 }
 0x1aa   :  { %261 = vsyncpa [#allocation4 + $0x1], 1 }

</bundles_post_ra>
